<compile_context>
chip_gen: v7x
topology: tpu7x:2x2x1
jax: 0.10.0
libtpu: 0.0.40
codegen_flags: <defaults>
</compile_context>

<pallas_src>
import functools

import jax
import jax.numpy as jnp
from jax.experimental import pallas as pl
from jax.experimental.pallas import tpu as pltpu


def _round_up(x, m):
    return (x + m - 1) // m * m


def _pick_batch_tile(B, block_b, min_steps=4):
    """Largest multiple-of-8 batch tile <= block_b that still yields >= min_steps
    grid steps when B is big enough (v7x megacore needs grid >= 2; >= 2 steps per
    core keeps the obs/out DMA pipelined)."""
    if B <= 8:
        return B
    target = _round_up(pl.cdiv(B, min_steps), 8)
    tb = max(8, min(block_b, target))
    return min(tb, _round_up(B, 8))


def dual_ac_kernel(obs_ref, w1_ref, b1_ref, w2_ref, b2_ref, wh_ref, bh_ref, out_ref):
    # MXU input dtype follows the (host-prepared) weight dtype; accumulation and all
    # elementwise math stay f32 (valid on v5e/v6e/v7x).
    mx_dtype = w1_ref.dtype

    x = obs_ref[...].astype(mx_dtype)

    # Hidden layer 1: Linear + ReLU.
    h1 = jnp.dot(x, w1_ref[...], preferred_element_type=jnp.float32) + b1_ref[...]
    h1 = jnp.maximum(h1, 0.0)

    # Hidden layer 2: Linear + ReLU.
    h2 = jnp.dot(h1.astype(mx_dtype), w2_ref[...],
                 preferred_element_type=jnp.float32) + b2_ref[...]
    h2 = jnp.maximum(h2, 0.0)

    # Fused heads: one matmul -> per-row [value | policy_logits | -1e30 pad].
    raw = jnp.dot(h2.astype(mx_dtype), wh_ref[...],
                  preferred_element_type=jnp.float32) + bh_ref[...]

    # Column 0 is the value head; padded columns already carry a -1e30 bias, so the
    # only remaining mask is excluding the value column from the softmax.
    col = jax.lax.broadcasted_iota(jnp.int32, (1, raw.shape[-1]), 1)
    is_value = col == 0                                   # (1, out_pad), broadcasts

    logits = jnp.where(is_value, jnp.float32(-1e30), raw)
    m = jnp.max(logits, axis=-1, keepdims=True)
    e = jnp.exp(logits - m)                               # value + pad cols -> 0
    denom = jnp.sum(e, axis=-1, keepdims=True)
    probs = e / denom                                     # exact divide: (tb,1) cheap

    # Lane-dense output slab: col 0 = value, cols 1..A = policy, rest ~0.
    out_ref[...] = jnp.where(is_value, raw, probs).astype(out_ref.dtype)


def prepare_params(p, *, use_bf16=False):
    """Fuse the two heads, zero-pad to lane-friendly widths, bake the softmax pad
    mask into the head bias, and (optionally) cast the weights to bf16 — all once,
    host side."""
    state_dim, hidden_dim = p["w1"].shape
    action_dim = p["wd"].shape[1]
    # v6e/v7x MXUs are 256-wide: align real (>=256) trunks to 256, tiny ones to 128.
    lane = 256 if hidden_dim >= 256 else 128
    hid = _round_up(hidden_dim, lane)
    out = _round_up(1 + action_dim, 128)
    f32 = jnp.float32
    w_dtype = jnp.bfloat16 if use_bf16 else jnp.float32

    w1 = jnp.zeros((state_dim, hid), f32).at[:, :hidden_dim].set(p["w1"])
    b1 = jnp.zeros((1, hid), f32).at[:, :hidden_dim].set(p["b1"])
    w2 = jnp.zeros((hid, hid), f32).at[:hidden_dim, :hidden_dim].set(p["w2"])
    b2 = jnp.zeros((1, hid), f32).at[:, :hidden_dim].set(p["b2"])
    wh = (jnp.zeros((hid, out), f32)
          .at[:hidden_dim, 0:1].set(p["wv"])
          .at[:hidden_dim, 1:1 + action_dim].set(p["wd"]))
    # Padded bias columns get -1e30 so their logits are pre-masked out of the softmax.
    bh = (jnp.full((1, out), -1e30, f32)
          .at[:, 0:1].set(p["bv"])
          .at[:, 1:1 + action_dim].set(p["bd"]))
    return {
        "w1": w1.astype(w_dtype), "b1": b1,      # biases stay f32 (added post-MXU)
        "w2": w2.astype(w_dtype), "b2": b2,
        "wh": wh.astype(w_dtype), "bh": bh,
    }, action_dim


def dual_ac_forward(obs, kp, *, action_dim, block_b=2048, min_steps=4,
                    out_dtype=jnp.float32):
    """DualACNET forward via one batch-tiled Pallas kernel. Returns (value, policy)."""
    B, state_dim = obs.shape
    hid = kp["w1"].shape[1]
    out_pad = kp["wh"].shape[1]

    tb = _pick_batch_tile(B, block_b, min_steps)
    grid = (pl.cdiv(B, tb),)

    # Resident weights (constant index_map) never need double-buffering; only bother
    # restricting it when they are actually big enough to threaten v7x VMEM.
    weight_bytes = int(kp["w2"].size) * kp["w2"].dtype.itemsize
    w_kwargs = {"pipeline_mode": pl.Buffered(1)} if weight_bytes > (8 << 20) else {}

    cost = pl.CostEstimate(
        flops=2 * B * (state_dim * hid + hid * hid + hid * out_pad),
        transcendentals=B * out_pad,
        bytes_accessed=(int(obs.size) * obs.dtype.itemsize
                        + B * out_pad * jnp.dtype(out_dtype).itemsize
                        + sum(int(v.size) * v.dtype.itemsize for v in kp.values())),
    )

    slab = pl.pallas_call(
        dual_ac_kernel,
        out_shape=jax.ShapeDtypeStruct((B, out_pad), out_dtype),
        grid=grid,
        in_specs=[
            pl.BlockSpec((tb, state_dim), lambda i: (i, 0)),     # obs: tiled on batch
            pl.BlockSpec((state_dim, hid), lambda i: (0, 0)),    # weights: VMEM-resident
            pl.BlockSpec((1, hid), lambda i: (0, 0)),
            pl.BlockSpec((hid, hid), lambda i: (0, 0), **w_kwargs),
            pl.BlockSpec((1, hid), lambda i: (0, 0)),
            pl.BlockSpec((hid, out_pad), lambda i: (0, 0), **w_kwargs),
            pl.BlockSpec((1, out_pad), lambda i: (0, 0)),
        ],
        out_specs=pl.BlockSpec((tb, out_pad), lambda i: (i, 0)),
        compiler_params=pltpu.CompilerParams(
            dimension_semantics=("parallel",),   # megacore splits the batch on v7x
            vmem_limit_bytes=32 * 1024 * 1024,   # ample: ~5 MiB footprint at tb=4096
        ),
        cost_estimate=cost,
    )(obs, kp["w1"], kp["b1"], kp["w2"], kp["b2"], kp["wh"], kp["bh"])

    value = slab[:, :1]
    policy = slab[:, 1:1 + action_dim]
    return value, policy


def init_params(key, state_dim, action_dim, hidden_dim):
    """Deterministic synthetic init (PyTorch Linear shapes, stored transposed to (in, out))."""
    ks = jax.random.split(key, 8)
    scale = 0.1
    return {
        "w1": scale * jax.random.normal(ks[0], (state_dim, hidden_dim), jnp.float32),
        "b1": scale * jax.random.normal(ks[1], (1, hidden_dim), jnp.float32),
        "w2": scale * jax.random.normal(ks[2], (hidden_dim, hidden_dim), jnp.float32),
        "b2": scale * jax.random.normal(ks[3], (1, hidden_dim), jnp.float32),
        "wd": scale * jax.random.normal(ks[4], (hidden_dim, action_dim), jnp.float32),
        "bd": scale * jax.random.normal(ks[5], (1, action_dim), jnp.float32),
        "wv": scale * jax.random.normal(ks[6], (hidden_dim, 1), jnp.float32),
        "bv": scale * jax.random.normal(ks[7], (1, 1), jnp.float32),
    }


def reference_forward(obs, p):
    """Pure-JAX reference matching the PyTorch module semantics."""
    h1 = jnp.maximum(obs @ p["w1"] + p["b1"], 0.0)
    h2 = jnp.maximum(h1 @ p["w2"] + p["b2"], 0.0)
    logits = h2 @ p["wd"] + p["bd"]
    policy = jax.nn.softmax(logits, axis=-1)
    value = h2 @ p["wv"] + p["bv"]
    return value, policy


if __name__ == "__main__":
    batch, state_dim, action_dim, hidden_dim = 8, 16, 8, 32

    key = jax.random.PRNGKey(0)
    k_obs, k_params, k_big = jax.random.split(key, 3)
    obs = jax.random.normal(k_obs, (batch, state_dim), jnp.float32)
    params = init_params(k_params, state_dim, action_dim, hidden_dim)
    ref_value, ref_policy = reference_forward(obs, params)

    # --- f32 path, small batch (primary correctness check; exact softmax divide) ---
    kparams, adim = prepare_params(params)
    fwd = jax.jit(functools.partial(dual_ac_forward, action_dim=adim))
    value, policy = jax.block_until_ready(fwd(obs, kparams))
    assert value.shape == (batch, 1)
    assert policy.shape == (batch, action_dim)
    assert jnp.allclose(value, ref_value, atol=1e-5, rtol=1e-5)
    assert jnp.allclose(policy, ref_policy, atol=1e-5, rtol=1e-5)
    assert jnp.allclose(jnp.sum(policy, axis=-1), 1.0, atol=1e-5)

    # --- larger batch: exercises the pipelined "parallel" batch grid (>= 4 steps) ---
    big_b = 1024
    obs_big = jax.random.normal(k_big, (big_b, state_dim), jnp.float32)
    v_big, p_big = jax.block_until_ready(fwd(obs_big, kparams))
    rv_big, rp_big = reference_forward(obs_big, params)
    assert jnp.allclose(v_big, rv_big, atol=1e-5, rtol=1e-5)
    assert jnp.allclose(p_big, rp_big, atol=1e-5, rtol=1e-5)

    # --- bf16-MXU fast path (valid on v5e/v6e/v7x): host-cast weights, bf16 output
    #     slab, f32 accumulation/elementwise; looser tolerance ---
    kparams16, adim16 = prepare_params(params, use_bf16=True)
    fwd_bf16 = jax.jit(functools.partial(dual_ac_forward, action_dim=adim16,
                                         out_dtype=jnp.bfloat16))
    v16, p16 = jax.block_until_ready(fwd_bf16(obs, kparams16))
    assert jnp.allclose(v16.astype(jnp.float32), ref_value, atol=5e-2, rtol=5e-2)
    assert jnp.allclose(p16.astype(jnp.float32), ref_policy, atol=5e-2, rtol=5e-2)
    assert jnp.allclose(jnp.sum(p16.astype(jnp.float32), axis=-1), 1.0, atol=2e-2)

    print("KERNEL_OK")
</pallas_src>

<mosaic_0001>
module attributes {stable_mosaic.version = 11 : i64} {
  func.func @dual_ac_kernel(%arg0: i32, %arg1: memref<8x16xf32, #tpu.memory_space<vmem>>, %arg2: memref<16x128xf32, #tpu.memory_space<vmem>>, %arg3: memref<1x128xf32, #tpu.memory_space<vmem>>, %arg4: memref<128x128xf32, #tpu.memory_space<vmem>>, %arg5: memref<1x128xf32, #tpu.memory_space<vmem>>, %arg6: memref<128x128xf32, #tpu.memory_space<vmem>>, %arg7: memref<1x128xf32, #tpu.memory_space<vmem>>, %arg8: memref<8x128xf32, #tpu.memory_space<vmem>>) attributes {dimension_semantics = [#tpu.dimension_semantics<parallel>], iteration_bounds = array<i64: 1>, scalar_prefetch = 0 : i64, scratch_operands = 0 : i64, tpu.core_type = #tpu.core_type<tc>, window_params = [{transform_indices = @transform_0, window_bounds = array<i64: 8, 16>}, {pipeline_mode = #tpu.pipeline_mode<synchronous>, transform_indices = @transform_1, window_bounds = array<i64: 16, 128>}, {pipeline_mode = #tpu.pipeline_mode<synchronous>, transform_indices = @transform_2, window_bounds = array<i64: 1, 128>}, {pipeline_mode = #tpu.pipeline_mode<synchronous>, transform_indices = @transform_3, window_bounds = array<i64: 128, 128>}, {pipeline_mode = #tpu.pipeline_mode<synchronous>, transform_indices = @transform_4, window_bounds = array<i64: 1, 128>}, {pipeline_mode = #tpu.pipeline_mode<synchronous>, transform_indices = @transform_5, window_bounds = array<i64: 128, 128>}, {pipeline_mode = #tpu.pipeline_mode<synchronous>, transform_indices = @transform_6, window_bounds = array<i64: 1, 128>}, {transform_indices = @transform_7, window_bounds = array<i64: 8, 128>}]} {
    %c0 = arith.constant 0 : index
    %c0_0 = arith.constant 0 : index
    %0 = vector.load %arg1[%c0, %c0_0] : memref<8x16xf32, #tpu.memory_space<vmem>>, vector<8x16xf32>
    %c0_1 = arith.constant 0 : index
    %c0_2 = arith.constant 0 : index
    %1 = vector.load %arg2[%c0_1, %c0_2] : memref<16x128xf32, #tpu.memory_space<vmem>>, vector<16x128xf32>
    %cst = arith.constant dense<0.000000e+00> : vector<8x128xf32>
    %2 = tpu.matmul %0, %1, %cst {dimension_numbers = #tpu.dot_dimension_numbers<[1], [0], [0], [1], [0, 0, 1, 1], [], []>} : vector<8x16xf32>, vector<16x128xf32>, vector<8x128xf32> -> vector<8x128xf32>
    %c0_3 = arith.constant 0 : index
    %c0_4 = arith.constant 0 : index
    %3 = vector.load %arg3[%c0_3, %c0_4] : memref<1x128xf32, #tpu.memory_space<vmem>>, vector<1x128xf32>
    %4 = vector.broadcast %3 : vector<1x128xf32> to vector<8x128xf32>
    %5 = arith.addf %2, %4 : vector<8x128xf32>
    %cst_5 = arith.constant 0.000000e+00 : f32
    %6 = vector.broadcast %cst_5 : f32 to vector<8x128xf32>
    %7 = arith.maximumf %5, %6 : vector<8x128xf32>
    %c0_6 = arith.constant 0 : index
    %c0_7 = arith.constant 0 : index
    %8 = vector.load %arg4[%c0_6, %c0_7] : memref<128x128xf32, #tpu.memory_space<vmem>>, vector<128x128xf32>
    %cst_8 = arith.constant dense<0.000000e+00> : vector<8x128xf32>
    %9 = tpu.matmul %7, %8, %cst_8 {dimension_numbers = #tpu.dot_dimension_numbers<[1], [0], [0], [1], [0, 0, 1, 1], [], []>} : vector<8x128xf32>, vector<128x128xf32>, vector<8x128xf32> -> vector<8x128xf32>
    %c0_9 = arith.constant 0 : index
    %c0_10 = arith.constant 0 : index
    %10 = vector.load %arg5[%c0_9, %c0_10] : memref<1x128xf32, #tpu.memory_space<vmem>>, vector<1x128xf32>
    %11 = vector.broadcast %10 : vector<1x128xf32> to vector<8x128xf32>
    %12 = arith.addf %9, %11 : vector<8x128xf32>
    %cst_11 = arith.constant 0.000000e+00 : f32
    %13 = vector.broadcast %cst_11 : f32 to vector<8x128xf32>
    %14 = arith.maximumf %12, %13 : vector<8x128xf32>
    %c0_12 = arith.constant 0 : index
    %c0_13 = arith.constant 0 : index
    %15 = vector.load %arg6[%c0_12, %c0_13] : memref<128x128xf32, #tpu.memory_space<vmem>>, vector<128x128xf32>
    %cst_14 = arith.constant dense<0.000000e+00> : vector<8x128xf32>
    %16 = tpu.matmul %14, %15, %cst_14 {dimension_numbers = #tpu.dot_dimension_numbers<[1], [0], [0], [1], [0, 0, 1, 1], [], []>} : vector<8x128xf32>, vector<128x128xf32>, vector<8x128xf32> -> vector<8x128xf32>
    %c0_15 = arith.constant 0 : index
    %c0_16 = arith.constant 0 : index
    %17 = vector.load %arg7[%c0_15, %c0_16] : memref<1x128xf32, #tpu.memory_space<vmem>>, vector<1x128xf32>
    %18 = vector.broadcast %17 : vector<1x128xf32> to vector<8x128xf32>
    %19 = arith.addf %16, %18 : vector<8x128xf32>
    %20 = tpu.iota {dimensions = array<i32: 1>} : vector<1x128xi32>
    %c0_i32 = arith.constant 0 : i32
    %21 = vector.broadcast %c0_i32 : i32 to vector<1x128xi32>
    %22 = arith.cmpi eq, %20, %21 : vector<1x128xi32>
    %cst_17 = arith.constant -1.000000e+30 : f32
    %23 = vector.shape_cast %22 : vector<1x128xi1> to vector<1x128xi1>
    %24 = vector.broadcast %23 : vector<1x128xi1> to vector<8x128xi1>
    %25 = vector.broadcast %cst_17 : f32 to vector<8x128xf32>
    %26 = arith.select %24, %25, %19 : vector<8x128xi1>, vector<8x128xf32>
    %cst_18 = arith.constant dense<0xFF800000> : vector<8xf32>
    %27 = vector.multi_reduction <maximumf>, %26, %cst_18 [1] : vector<8x128xf32> to vector<8xf32>
    %28 = vector.shape_cast %27 : vector<8xf32> to vector<8x1xf32>
    %29 = vector.broadcast %28 : vector<8x1xf32> to vector<8x128xf32>
    %30 = arith.subf %26, %29 : vector<8x128xf32>
    %31 = math.exp %30 : vector<8x128xf32>
    %cst_19 = arith.constant dense<0.000000e+00> : vector<8xf32>
    %32 = vector.multi_reduction <add>, %31, %cst_19 [1] : vector<8x128xf32> to vector<8xf32>
    %33 = vector.shape_cast %32 : vector<8xf32> to vector<8x1xf32>
    %34 = vector.broadcast %33 : vector<8x1xf32> to vector<8x128xf32>
    %35 = arith.divf %31, %34 : vector<8x128xf32>
    %36 = vector.shape_cast %22 : vector<1x128xi1> to vector<1x128xi1>
    %37 = vector.broadcast %36 : vector<1x128xi1> to vector<8x128xi1>
    %38 = arith.select %37, %19, %35 : vector<8x128xi1>, vector<8x128xf32>
    %c0_20 = arith.constant 0 : index
    %c0_21 = arith.constant 0 : index
    %39 = vector.load %arg8[%c0_20, %c0_21] : memref<8x128xf32, #tpu.memory_space<vmem>>, vector<8x128xf32>
    tpu.vector_store %arg8[%c0_20, %c0_21], %38 {strides = array<i32>} : memref<8x128xf32, #tpu.memory_space<vmem>>, vector<8x128xf32>,
    return
  }
  func.func @transform_0(%arg0: i32) -> (i32, i32) {
    %c0_i32 = arith.constant 0 : i32
    %c0_i32_0 = arith.constant 0 : i32
    return %arg0, %c0_i32 : i32, i32
  }
  func.func @transform_1(%arg0: i32) -> (i32, i32) {
    %c0_i32 = arith.constant 0 : i32
    %c0_i32_0 = arith.constant 0 : i32
    %c0_i32_1 = arith.constant 0 : i32
    return %c0_i32, %c0_i32_0 : i32, i32
  }
  func.func @transform_2(%arg0: i32) -> (i32, i32) {
    %c0_i32 = arith.constant 0 : i32
    %c0_i32_0 = arith.constant 0 : i32
    %c0_i32_1 = arith.constant 0 : i32
    return %c0_i32, %c0_i32_0 : i32, i32
  }
  func.func @transform_3(%arg0: i32) -> (i32, i32) {
    %c0_i32 = arith.constant 0 : i32
    %c0_i32_0 = arith.constant 0 : i32
    %c0_i32_1 = arith.constant 0 : i32
    return %c0_i32, %c0_i32_0 : i32, i32
  }
  func.func @transform_4(%arg0: i32) -> (i32, i32) {
    %c0_i32 = arith.constant 0 : i32
    %c0_i32_0 = arith.constant 0 : i32
    %c0_i32_1 = arith.constant 0 : i32
    return %c0_i32, %c0_i32_0 : i32, i32
  }
  func.func @transform_5(%arg0: i32) -> (i32, i32) {
    %c0_i32 = arith.constant 0 : i32
    %c0_i32_0 = arith.constant 0 : i32
    %c0_i32_1 = arith.constant 0 : i32
    return %c0_i32, %c0_i32_0 : i32, i32
  }
  func.func @transform_6(%arg0: i32) -> (i32, i32) {
    %c0_i32 = arith.constant 0 : i32
    %c0_i32_0 = arith.constant 0 : i32
    %c0_i32_1 = arith.constant 0 : i32
    return %c0_i32, %c0_i32_0 : i32, i32
  }
  func.func @transform_7(%arg0: i32) -> (i32, i32) {
    %c0_i32 = arith.constant 0 : i32
    %c0_i32_0 = arith.constant 0 : i32
    return %arg0, %c0_i32 : i32, i32
  }
}

</mosaic_0001>

<bundles_post_ra>
// kernel: dual_ac_forward.1
= control target key start
LH: loop header
LB: loop body
LE: loop exit
PB: predicated region body
PF: predicated region fallthrough
CT: control target
= control target key end

     0   :  { %12 = vsyncpa [#allocation3], 0  ;;  %s789_s0 = inlined_call_operand.hbm [shape: f32[8,16], index: 0, kind: input, shape index: {}]   ;;  %s790_s1 = inlined_call_operand.hbm [shape: f32[16,128], index: 1, kind: input, shape index: {}]   ;;  %s791_s2 = inlined_call_operand.vmem [shape: f32[1,128], index: 2, kind: input, shape index: {}]   ;;  %s792_s3 = inlined_call_operand.hbm [shape: f32[128,128], index: 3, kind: input, shape index: {}]   ;;  %s793_s4 = inlined_call_operand.vmem [shape: f32[1,128], index: 4, kind: input, shape index: {}]   ;;  %s794_s5 = inlined_call_operand.hbm [shape: f32[128,128], index: 5, kind: input, shape index: {}]   ;;  %s795_s6 = inlined_call_operand.vmem [shape: f32[1,128], index: 6, kind: input, shape index: {}]   ;;  %s796_s7 = inlined_call_operand.vmem [shape: f32[8,128], index: 7, kind: output, shape index: {}]  }
   0x1   :  { %13 = vsyncpa [#allocation5], 0 }
   0x2   :  { %14 = vsyncpa [#allocation8], 0  ;;  %s651_s24 = smov [#allocation4]   ;;  %s557_s28 = scalar_lea.hbm %s790_s1, 256 }
   0x3   :  { %s30_s25 = sshll.u32 %s651_s24, 4  ;;  %p558_p0 = scmp.ne.s32.totalorder %s790_s1, %s557_s28  ;;  %s31_s25 = int_to_ptr.vmem [resolvable:$true] %s30_s25 }
   0x4   :  { %p561_p1 = scmp.lt.u32.totalorder %s557_s28, %s790_s1 }
   0x6   :  { %p563_p2 = pnand %p561_p1, %p558_p0 }
   0x8   :  { %566 = shalt.err (!%p563_p2)
}
   0x9   :  { %s567_s10 = scalar_lea.vmem %s31_s25, 256  ;;  %p572_p4 = scmp.lt.s32.totalorder %s31_s25, %s31_s25 }
   0xa   :  { %p568_p3 = scmp.ne.s32.totalorder %s31_s25, %s567_s10  ;;  %p573_p5 = scmp.lt.s32.totalorder %s567_s10, %s567_s10 }
   0xc   :  { %p574_p6 = por %p573_p5, %p572_p4 }
   0xe   :  { %p575_p7 = pnand %p574_p6, %p568_p3 }
  0x10   :  { %578 = shalt.err (!%p575_p7)
}
  0x11   :  { %s652_s11 = smov 128   ;;  %s653_s12 = smov 8  }
  0x12   :  { %36 = dma.hbm_to_vmem [thread:$0]  %s790_s1, 256, %s31_s25, [#allocation5], %s652_s11, %s652_s11, %s653_s12  }
  0x13   :  { %s654_s15 = smov [#allocation2]   ;;  %s655_s17 = smov [#allocation6]  }
  0x14   :  { %s21_s16 = sshll.u32 %s654_s15, 4  ;;  %s44_s18 = sshll.u32 %s655_s17, 4  ;;  %s22_s16 = int_to_ptr.vmem [resolvable:$true] %s21_s16  ;;  %s45_s18 = int_to_ptr.vmem [resolvable:$true] %s44_s18 }
  0x15   :  { %s579_s21 = scalar_lea.hbm %s789_s0, 128 }
  0x16   :  { %p580_p8 = scmp.ne.s32.totalorder %s789_s0, %s579_s21  ;;  %p583_p9 = scmp.lt.u32.totalorder %s579_s21, %s789_s0 }
  0x18   :  { %p585_p10 = pnand %p583_p9, %p580_p8 }
  0x1a   :  { %588 = shalt.err (!%p585_p10)
}
  0x1b   :  { %s589_s1 = scalar_lea.vmem %s22_s16, 128  ;;  %p594_p12 = scmp.lt.s32.totalorder %s22_s16, %s22_s16 }
  0x1c   :  { %p590_p11 = scmp.ne.s32.totalorder %s22_s16, %s589_s1  ;;  %p595_p13 = scmp.lt.s32.totalorder %s589_s1, %s589_s1 }
  0x1e   :  { %p596_p0 = por %p595_p13, %p594_p12 }
  0x20   :  { %p597_p1 = pnand %p596_p0, %p590_p11 }
  0x22   :  { %600 = shalt.err (!%p597_p1)
}
  0x23   :  { %24 = dma.hbm_to_vmem [thread:$0]  %s789_s0, 128, %s22_s16, [#allocation3]  }
  0x24   :  { %s601_s30 = scalar_lea.hbm %s792_s3, 2048 }
  0x25   :  { %p602_p2 = scmp.ne.s32.totalorder %s792_s3, %s601_s30  ;;  %p605_p3 = scmp.lt.u32.totalorder %s601_s30, %s792_s3 }
  0x27   :  { %p607_p4 = pnand %p605_p3, %p602_p2 }
  0x29   :  { %610 = shalt.err (!%p607_p4)
}
  0x2a   :  { %s611_s14 = scalar_lea.vmem %s45_s18, 2048  ;;  %p616_p6 = scmp.lt.s32.totalorder %s45_s18, %s45_s18 }
  0x2b   :  { %p612_p5 = scmp.ne.s32.totalorder %s45_s18, %s611_s14  ;;  %p617_p7 = scmp.lt.s32.totalorder %s611_s14, %s611_s14 }
  0x2d   :  { %p618_p8 = por %p617_p7, %p616_p6 }
  0x2f   :  { %p619_p9 = pnand %p618_p8, %p612_p5 }
  0x31   :  { %622 = shalt.err (!%p619_p9)
}
  0x32   :  { %50 = dma.hbm_to_vmem [thread:$0]  %s792_s3, 2048, %s45_s18, [#allocation5], %s652_s11, %s652_s11, %s653_s12  }
  0x33   :  { %s656_s16 = smov [#allocation7]   ;;  %s623_s21 = scalar_lea.hbm %s794_s5, 2048 }
  0x34   :  { %s58_s17 = sshll.u32 %s656_s16, 4  ;;  %p624_p10 = scmp.ne.s32.totalorder %s794_s5, %s623_s21  ;;  %s59_s17 = int_to_ptr.vmem [resolvable:$true] %s58_s17 }
  0x35   :  { %p627_p11 = scmp.lt.u32.totalorder %s623_s21, %s794_s5 }
  0x37   :  { %p629_p12 = pnand %p627_p11, %p624_p10 }
  0x39   :  { %632 = shalt.err (!%p629_p12)
}
  0x3a   :  { %s633_s1 = scalar_lea.vmem %s59_s17, 2048  ;;  %p638_p0 = scmp.lt.s32.totalorder %s59_s17, %s59_s17 }
  0x3b   :  { %p634_p13 = scmp.ne.s32.totalorder %s59_s17, %s633_s1  ;;  %p639_p1 = scmp.lt.s32.totalorder %s633_s1, %s633_s1 }
  0x3d   :  { %p640_p2 = por %p639_p1, %p638_p0 }
  0x3f   :  { %p641_p3 = pnand %p640_p2, %p634_p13 }
  0x41   :  { %644 = shalt.err (!%p641_p3)
}
  0x42   :  { %64 = dma.hbm_to_vmem [thread:$0]  %s794_s5, 2048, %s59_s17, [#allocation8], %s652_s11, %s652_s11, %s653_s12  }
  0x43   :  { %645 = dma.done.wait [#allocation3], 128  }
  0x44   :  { %646 = vsyncadd [#allocation3], 4294967168 }
  0x45   :  { %647 = dma.done.wait [#allocation5], 2304  }
  0x46   :  { %648 = vsyncadd [#allocation5], 4294964992 }
  0x47   :  { %649 = dma.done.wait [#allocation8], 2048  }
  0x48   :  { %650 = vsyncadd [#allocation8], 4294965248  ;;  %v657_v0 = vmov 0.0|0.0   ;;  %vm658_vm0 = vmmov 0   ;;  %v659_v1 = vmov 0.0   ;;  %v80_v2 = vld [vmem:[#allocation4] sm:$0xff] }
  0x49   :  { %493 = vmatprep.subr.bf16.mxu0 %v657_v0  ;;  %420 = vmatprep.mubr.msk.f32.mxu0 %vm658_vm0, %v659_v1  ;;  %v81_v3 = vld [vmem:[#allocation4 + $0x8] sm:$0xff]  ;;  %v164_v5 = vld [vmem:[#allocation6] sm:$0xff]  ;;  %v165_v6 = vld [vmem:[#allocation6 + $0x8] sm:$0xff]  ;;  %vm89_vm1 = vcmask 130048  }
  0x4a   :  { %496 = vmatprep.subr.bf16.mxu1 %v657_v0  ;;  %455 = vmatprep.mubr.msk.f32.mxu1 %vm658_vm0, %v659_v1  ;;  %v494_v4 = vpack.c.bf16 %v81_v3, %v80_v2  ;;  %v166_v7 = vld [vmem:[#allocation6 + $0x10] sm:$0xff]  ;;  %v497_v8 = vpack.c.bf16 %v165_v6, %v164_v5  ;;  %v167_v9 = vld [vmem:[#allocation6 + $0x18] sm:$0xff]  ;;  %v79_v10 = vld [vmem:[#allocation2] sm:$0xff] }
  0x4b   :  { %v500_v11 = vpack.c.bf16 %v167_v9, %v166_v7  ;;  %v168_v12 = vld [vmem:[#allocation6 + $0x20] sm:$0xff]  ;;  %v169_v13 = vld [vmem:[#allocation6 + $0x28] sm:$0xff]  ;;  %v170_v15 = vld [vmem:[#allocation6 + $0x30] sm:$0xff] }
  0x4c   :  { %495 = vmatpush3.bf16.msra.mxu0 %v494_v4  ;;  %498 = vmatpush3.bf16.msra.mxu1 %v497_v8  ;;  %v503_v14 = vpack.c.bf16 %v169_v13, %v168_v12  ;;  %v171_v16 = vld [vmem:[#allocation6 + $0x38] sm:$0xff]  ;;  %v172_v18 = vld [vmem:[#allocation6 + $0x40] sm:$0xff]  ;;  %v173_v19 = vld [vmem:[#allocation6 + $0x48] sm:$0xff] }
  0x4d   :  { %520 = vmatprep.subr.bf16.mxu0 %v657_v0  ;;  %499 = vmatprep.subr.bf16.mxu1 %v657_v0  ;;  %v506_v17 = vpack.c.bf16 %v171_v16, %v170_v15  ;;  %v509_v20 = vpack.c.bf16 %v173_v19, %v172_v18  ;;  %v174_v21 = vld [vmem:[#allocation6 + $0x50] sm:$0xff]  ;;  %v175_v22 = vld [vmem:[#allocation6 + $0x58] sm:$0xff]  ;;  %v176_v24 = vld [vmem:[#allocation6 + $0x60] sm:$0xff] }
  0x4e   :  { %v512_v23 = vpack.c.bf16 %v175_v22, %v174_v21  ;;  %v177_v25 = vld [vmem:[#allocation6 + $0x68] sm:$0xff]  ;;  %v178_v27 = vld [vmem:[#allocation6 + $0x70] sm:$0xff]  ;;  %v179_v28 = vld [vmem:[#allocation6 + $0x78] sm:$0xff] }
  0x4f   :  { %421 = vmatmul.mubr.msk.f32.vlgmr.msra.gmra.mrb[0].mxu0 %vm89_vm1, %v79_v10  ;;  %v515_v26 = vpack.c.bf16 %v177_v25, %v176_v24  ;;  %v518_v29 = vpack.c.bf16 %v179_v28, %v178_v27  ;;  %v258_v30 = vld [vmem:[#allocation7] sm:$0xff]  ;;  %v259_v31 = vld [vmem:[#allocation7 + $0x8] sm:$0xff]  ;;  %v260_v32 = vld [vmem:[#allocation7 + $0x10] sm:$0xff] }
  0x50   :  { %490 = vmatprep.mubr.msk.f32.mxu0 %vm658_vm0, %v659_v1  ;;  %501 = vmatpush3.bf16.msra.mxu1 %v500_v11  ;;  %v521_v33 = vpack.c.bf16 %v259_v31, %v258_v30  ;;  %v261_v34 = vld [vmem:[#allocation7 + $0x18] sm:$0xff]  ;;  %v262_v36 = vld [vmem:[#allocation7 + $0x20] sm:$0xff]  ;;  %v263_v37 = vld [vmem:[#allocation7 + $0x28] sm:$0xff] }
  0x51   :  { %502 = vmatprep.subr.bf16.mxu1 %v657_v0  ;;  %v524_v35 = vpack.c.bf16 %v261_v34, %v260_v32  ;;  %v527_v38 = vpack.c.bf16 %v263_v37, %v262_v36  ;;  %v264_v39 = vld [vmem:[#allocation7 + $0x30] sm:$0xff]  ;;  %v265_v40 = vld [vmem:[#allocation7 + $0x38] sm:$0xff]  ;;  %v266_v42 = vld [vmem:[#allocation7 + $0x40] sm:$0xff] }
  0x52   :  { %522 = vmatpush3.bf16.msra.mxu0 %v521_v33  ;;  %v530_v41 = vpack.c.bf16 %v265_v40, %v264_v39  ;;  %v267_v43 = vld [vmem:[#allocation7 + $0x48] sm:$0xff]  ;;  %v268_v45 = vld [vmem:[#allocation7 + $0x50] sm:$0xff]  ;;  %v269_v46 = vld [vmem:[#allocation7 + $0x58] sm:$0xff] }
  0x53   :  { %523 = vmatprep.subr.bf16.mxu0 %v657_v0  ;;  %v533_v44 = vpack.c.bf16 %v267_v43, %v266_v42  ;;  %v536_v47 = vpack.c.bf16 %v269_v46, %v268_v45  ;;  %v270_v48 = vld [vmem:[#allocation7 + $0x60] sm:$0xff]  ;;  %v271_v49 = vld [vmem:[#allocation7 + $0x68] sm:$0xff]  ;;  %v272_v56 = vld [vmem:[#allocation7 + $0x70] sm:$0xff] }
  0x54   :  { %504 = vmatpush3.bf16.msra.mxu1 %v503_v14  ;;  %v539_v50 = vpack.c.bf16 %v271_v49, %v270_v48  ;;  %v375_v51 = vld [vmem:[%s791_s2] ss:$0 sm:$0xff]  ;;  %v273_v57 = vld [vmem:[#allocation7 + $0x78] sm:$0xff] }
  0x55   :  { %505 = vmatprep.subr.bf16.mxu1 %v657_v0  ;;  %v542_v58 = vpack.c.bf16 %v273_v57, %v272_v56  ;;  %v377_v59 = vld [vmem:[%s793_s4] ss:$0 sm:$0xff] }
  0x56   :  { %525 = vmatpush3.bf16.msra.mxu0 %v524_v35  ;;  %v378_v2 = vld [vmem:[%s795_s6] ss:$0 sm:$0xff] }
  0x57   :  { %526 = vmatprep.subr.bf16.mxu0 %v657_v0 }
  0x58   :  { %507 = vmatpush3.bf16.msra.mxu1 %v506_v17 }
  0x59   :  { %508 = vmatprep.subr.bf16.mxu1 %v657_v0 }
  0x5a   :  { %528 = vmatpush3.bf16.msra.mxu0 %v527_v38 }
  0x5b   :  { %529 = vmatprep.subr.bf16.mxu0 %v657_v0 }
  0x5c   :  { %510 = vmatpush3.bf16.msra.mxu1 %v509_v20 }
  0x5d   :  { %511 = vmatprep.subr.bf16.mxu1 %v657_v0 }
  0x5e   :  { %531 = vmatpush3.bf16.msra.mxu0 %v530_v41 }
  0x5f   :  { %532 = vmatprep.subr.bf16.mxu0 %v657_v0 }
  0x60   :  { %513 = vmatpush3.bf16.msra.mxu1 %v512_v23 }
  0x61   :  { %514 = vmatprep.subr.bf16.mxu1 %v657_v0 }
  0x62   :  { %534 = vmatpush3.bf16.msra.mxu0 %v533_v44 }
  0x63   :  { %535 = vmatprep.subr.bf16.mxu0 %v657_v0 }
  0x64   :  { %516 = vmatpush3.bf16.msra.mxu1 %v515_v26 }
  0x65   :  { %517 = vmatprep.subr.bf16.mxu1 %v657_v0 }
  0x66   :  { %537 = vmatpush3.bf16.msra.mxu0 %v536_v47 }
  0x67   :  { %538 = vmatprep.subr.bf16.mxu0 %v657_v0 }
  0x68   :  { %519 = vmatpush3.bf16.msra.mxu1 %v518_v29 }
  0x6a   :  { %540 = vmatpush3.bf16.msra.mxu0 %v539_v50 }
  0x6b   :  { %541 = vmatprep.subr.bf16.mxu0 %v657_v0  ;;  %v351_v0 = vlaneseq }
  0x6d   :  { %v352_v1 = vand.u32 127, %v351_v0 }
  0x6e   :  { %543 = vmatpush3.bf16.msra.mxu0 %v542_v58 }
  0x6f   :  { %vm353_vm2 = vcmp.eq.s32.totalorder %v352_v1, 0 }
 0x122   :  { %v159_v52 = vpop.f32.mrb[0].mxu0 }
 0x123   :  { %v160_v53 = vadd.f32 %v375_v51, %v159_v52  ;;  %v422_v54 = vpop.f32.mrb[1].mxu0 }
 0x125   :  { %v163_v55 = vmax.f32 %v160_v53, 0.0 }
 0x127   :  { %456 = vmatmul.mubr.f32.vlgmr.msra.gmra.mrb[0].mxu1 %v163_v55 }
 0x1fa   :  { %v253_v60 = vpop.f32.mrb[0].mxu1 }
 0x1fb   :  { %v254_v61 = vadd.f32 %v377_v59, %v253_v60  ;;  %v457_v62 = vpop.f32.mrb[1].mxu1 }
 0x1fd   :  { %v257_v63 = vmax.f32 %v254_v61, 0.0 }
 0x1ff   :  { %491 = vmatmul.mubr.f32.vlgmr.msra.gmra.mrb[2].mxu0 %v257_v63 }
 0x2d2   :  { %v347_v3 = vpop.f32.mrb[2].mxu0 }
 0x2d3   :  { %v348_v4 = vadd.f32 %v378_v2, %v347_v3  ;;  %v492_v5 = vpop.f32.mrb[3].mxu0 }
 0x2d5   :  { %v356_v6 = vsel %vm353_vm2, -1e+30, %v348_v4 }
 0x2d6   :  { %357 = vmax.xlane.f32.xlu0 %v356_v6 }
 0x363   :  { %v358_v7 = vpop.xlane.xlu0 %357 }
 0x364   :  { %v359_v8 = vsub.f32 %v356_v6, %v358_v7 }
 0x366   :  { %v360_v9 = vmul.f32 1.442695, %v359_v8 }
 0x368   :  { %553 = vpow2.f32 %v360_v9 }
 0x372   :  { %v554_v10 = vpop.eup %553 }
 0x373   :  { %362 = vadd.xlane.f32.xlu0 %v554_v10 }
 0x400   :  { %v363_v11 = vpop.xlane.xlu0 %362 }
 0x401   :  { %555 = vrcp.f32 %v363_v11 }
 0x40b   :  { %v556_v12 = vpop.eup %555 }
 0x40c   :  { %v365_v13 = vmul.f32 %v556_v12, %v554_v10 }
 0x40e   :  { %v366_v14 = vsel %vm353_vm2, %v348_v4, %v365_v13 }
 0x40f   :  { %367 = vst [vmem:[%s796_s7] sm:$0xff] %v366_v14 }
 0x410   :  { %372 = vsyncpa [#allocation3], 1 }
 0x411   :  { %373 = vsyncpa [#allocation5], 1 }
 0x412   :  { %374 = vsyncpa [#allocation8], 1 }

</bundles_post_ra>
